<compile_context>
chip_gen: v7x
topology: tpu7x:2x2x1
jax: 0.10.0
libtpu: 0.0.40
codegen_flags: <defaults>
</compile_context>

<pallas_src>
import functools

import jax
import jax.numpy as jnp
from jax.experimental import pallas as pl
from jax.experimental.pallas import tpu as pltpu

_MIB = 1024 * 1024


def _layernorm_kernel(x_ref, w_ref, b_ref, o_ref, *, eps):
    # Stream the block in its native dtype; do the math in f32.
    x = x_ref[...].astype(jnp.float32)                    # (row_tile, H)
    mean = jnp.mean(x, axis=-1, keepdims=True)
    xc = x - mean                                         # reused for var AND output
    var = jnp.mean(xc * xc, axis=-1, keepdims=True)       # two-pass: no cancellation
    inv = jax.lax.rsqrt(var + eps)
    w = w_ref[0:1, :]                                     # (1, H) view of resident (8, H) tile
    b = b_ref[0:1, :]
    o_ref[...] = (xc * inv * w + b).astype(o_ref.dtype)


def _vmem_budget_and_block_target():
    """Return (scoped-VMEM budget bytes, f32 working-block byte target), chip-aware."""
    vmem_phys = None
    try:
        vmem_phys = int(pltpu.get_tpu_info().vmem_capacity_bytes)
    except Exception:
        vmem_phys = None
    if vmem_phys is None:
        try:
            kind = jax.devices()[0].device_kind.lower()
        except Exception:
            kind = ""
        if ("v4" in kind) or ("v5" in kind) or ("v6" in kind):
            vmem_phys = 128 * _MIB
        else:
            vmem_phys = 64 * _MIB            # v7x / unknown: be conservative
    budget = max(32 * _MIB, min((vmem_phys * 3) // 4, 100 * _MIB))
    target = 16 * _MIB if vmem_phys >= 96 * _MIB else 12 * _MIB
    return budget, target


def _per_row_vmem_bytes(hidden, itemsize):
    # 2 double-buffered native-dtype blocks (input + output) plus ~3 f32
    # full-tile temporaries (x cast, xc, pre-cast output) per block row.
    return hidden * (2 * 2 * itemsize + 3 * 4)


def _pick_row_tile(rows, hidden, dtype, target_f32_block_bytes, vmem_budget):
    itemsize = jnp.dtype(dtype).itemsize
    pack = 8 * max(1, 4 // max(itemsize, 1))       # 8 f32 / 16 bf16 / 32 int8
    rows_padded = ((rows + pack - 1) // pack) * pack

    # Byte target (amortizes the per-grid-step pipeline overhead); no row cap.
    rt = max(pack, target_f32_block_bytes // (hidden * 4))

    # Shrink (never grow) until the pipeline buffers fit the VMEM budget.
    fixed = 2 * 8 * hidden * 4 + (1 * _MIB)        # params + headroom
    rt_vmem = max(pack, (vmem_budget - fixed) // _per_row_vmem_bytes(hidden, itemsize))
    rt = min(rt, rt_vmem)

    # Keep >= 2 grid steps when possible (v7x has 2 TCs; also keeps the DMA
    # pipeline warm). Costs nothing on 1-TC chips.
    if rows_padded >= 2 * pack:
        half = (((rows_padded + 1) // 2) + pack - 1) // pack * pack
        rt = min(rt, half)

    rt = max((rt // pack) * pack, pack)
    return int(min(rt, rows_padded))


def layer_norm(x, weight=None, bias=None, eps=1e-5, *, row_tile=None):
    """LayerNorm over the last axis. x: (..., H); weight/bias: (H,) or None."""
    orig_shape = x.shape
    orig_dtype = x.dtype
    H = int(orig_shape[-1])
    R = 1
    for d in orig_shape[:-1]:
        R *= int(d)
    x2d = x.reshape(R, H)

    # elementwise_affine=False path: identity affine.
    if weight is None:
        weight = jnp.ones((H,), jnp.float32)
    if bias is None:
        bias = jnp.zeros((H,), jnp.float32)
    # f32 cast + sublane-dense (8, H) broadcast hoisted out of the kernel body.
    w8 = jnp.broadcast_to(weight.reshape(1, H).astype(jnp.float32), (8, H))
    b8 = jnp.broadcast_to(bias.reshape(1, H).astype(jnp.float32), (8, H))

    vmem_budget, block_target = _vmem_budget_and_block_target()
    if row_tile is None:
        row_tile = _pick_row_tile(R, H, orig_dtype, block_target, vmem_budget)

    grid = (pl.cdiv(R, row_tile),)

    # Scoped VMEM limit: never below the computed requirement (would break
    # double-buffering / fail compile); only clamp to the budget when it fits.
    itemsize = jnp.dtype(orig_dtype).itemsize
    needed = row_tile * _per_row_vmem_bytes(H, itemsize) + 2 * 8 * H * 4 + (1 * _MIB)
    vmem_limit = int(max(needed, 32 * _MIB))
    if needed <= vmem_budget:
        vmem_limit = int(min(vmem_limit, vmem_budget))

    kernel = functools.partial(_layernorm_kernel, eps=float(eps))

    # TODO(synk): for H < 128 (or H not a multiple of 128) the last dim is
    # lane-sparse; folding several rows into the lane axis in the wrapper would
    # avoid masked partial stores. Not needed for the shapes exercised here.
    out = pl.pallas_call(
        kernel,
        out_shape=jax.ShapeDtypeStruct((R, H), orig_dtype),
        grid=grid,
        in_specs=[
            pl.BlockSpec((row_tile, H), lambda i: (i, 0)),   # x row tile (native dtype)
            pl.BlockSpec((8, H), lambda i: (0, 0)),          # weight (f32, resident)
            pl.BlockSpec((8, H), lambda i: (0, 0)),          # bias   (f32, resident)
        ],
        out_specs=pl.BlockSpec((row_tile, H), lambda i: (i, 0)),
        compiler_params=pltpu.CompilerParams(
            dimension_semantics=("parallel",),               # megacore-shardable
            vmem_limit_bytes=vmem_limit,
        ),
    )(x2d, w8, b8)

    return out.reshape(orig_shape)


def layer_norm_ref(x, weight, bias, eps=1e-5):
    xf = x.astype(jnp.float32)
    mean = jnp.mean(xf, axis=-1, keepdims=True)
    mean_x2 = jnp.mean(xf * xf, axis=-1, keepdims=True)
    var = jnp.maximum(mean_x2 - mean * mean, 0.0)
    x_norm = (xf - mean) / jnp.sqrt(var + eps)
    y = weight.astype(jnp.float32) * x_norm + bias.astype(jnp.float32)
    return y.astype(x.dtype)


if __name__ == "__main__":
    key = jax.random.PRNGKey(0)
    k_x, k_w, k_b, k_x2 = jax.random.split(key, 4)

    # --- f32 test (small shapes; normalized_shape = (H,)) ---
    B, S, H = 2, 8, 128
    x = jax.random.normal(k_x, (B, S, H), dtype=jnp.float32)
    weight = jnp.ones((H,), jnp.float32) + 0.1 * jax.random.normal(k_w, (H,), jnp.float32)
    bias = 0.1 * jax.random.normal(k_b, (H,), jnp.float32)

    out = jax.block_until_ready(layer_norm(x, weight, bias, eps=1e-5))
    ref = layer_norm_ref(x, weight, bias, eps=1e-5)
    assert out.shape == x.shape and out.dtype == x.dtype
    assert jnp.allclose(out, ref, atol=1e-5, rtol=1e-5), "f32 mismatch vs reference"

    # --- ragged-row test (R not a multiple of the row tile; exercises cdiv grid) ---
    x_rag = jax.random.normal(k_x2, (3, 5, H), dtype=jnp.float32)
    out_rag = jax.block_until_ready(layer_norm(x_rag, weight, bias, eps=1e-5))
    ref_rag = layer_norm_ref(x_rag, weight, bias, eps=1e-5)
    assert jnp.allclose(out_rag, ref_rag, atol=1e-5, rtol=1e-5), "ragged mismatch"

    # --- bf16 test (native-dtype streaming; looser tolerance expected) ---
    x_bf = x.astype(jnp.bfloat16)
    out_bf = jax.block_until_ready(layer_norm(x_bf, weight, bias, eps=1e-5))
    ref_bf = layer_norm_ref(x_bf, weight, bias, eps=1e-5)
    assert out_bf.dtype == jnp.bfloat16
    assert jnp.allclose(out_bf.astype(jnp.float32), ref_bf.astype(jnp.float32),
                        atol=2e-2, rtol=2e-2), "bf16 mismatch vs reference"

    print("KERNEL_OK")
</pallas_src>

<mosaic_0001>
module attributes {stable_mosaic.version = 11 : i64} {
  func.func @_layernorm_kernel(%arg0: i32, %arg1: memref<8x128xf32, #tpu.memory_space<vmem>>, %arg2: memref<8x128xf32, #tpu.memory_space<vmem>>, %arg3: memref<8x128xf32, #tpu.memory_space<vmem>>, %arg4: memref<8x128xf32, #tpu.memory_space<vmem>>) attributes {dimension_semantics = [#tpu.dimension_semantics<parallel>], iteration_bounds = array<i64: 2>, scalar_prefetch = 0 : i64, scratch_operands = 0 : i64, tpu.core_type = #tpu.core_type<tc>, window_params = [{transform_indices = @transform_0, window_bounds = array<i64: 8, 128>}, {pipeline_mode = #tpu.pipeline_mode<synchronous>, transform_indices = @transform_1, window_bounds = array<i64: 8, 128>}, {pipeline_mode = #tpu.pipeline_mode<synchronous>, transform_indices = @transform_2, window_bounds = array<i64: 8, 128>}, {transform_indices = @transform_3, window_bounds = array<i64: 8, 128>}]} {
    %c0 = arith.constant 0 : index
    %c0_0 = arith.constant 0 : index
    %0 = vector.load %arg1[%c0, %c0_0] : memref<8x128xf32, #tpu.memory_space<vmem>>, vector<8x128xf32>
    %cst = arith.constant dense<0.000000e+00> : vector<8xf32>
    %1 = vector.multi_reduction <add>, %0, %cst [1] : vector<8x128xf32> to vector<8xf32>
    %2 = vector.shape_cast %1 : vector<8xf32> to vector<8x1xf32>
    %cst_1 = arith.constant 1.280000e+02 : f32
    %3 = vector.broadcast %cst_1 : f32 to vector<8x1xf32>
    %4 = arith.divf %2, %3 : vector<8x1xf32>
    %5 = vector.broadcast %4 : vector<8x1xf32> to vector<8x128xf32>
    %6 = arith.subf %0, %5 : vector<8x128xf32>
    %7 = arith.mulf %6, %6 : vector<8x128xf32>
    %cst_2 = arith.constant dense<0.000000e+00> : vector<8xf32>
    %8 = vector.multi_reduction <add>, %7, %cst_2 [1] : vector<8x128xf32> to vector<8xf32>
    %9 = vector.shape_cast %8 : vector<8xf32> to vector<8x1xf32>
    %cst_3 = arith.constant 1.280000e+02 : f32
    %10 = vector.broadcast %cst_3 : f32 to vector<8x1xf32>
    %11 = arith.divf %9, %10 : vector<8x1xf32>
    %cst_4 = arith.constant 9.99999974E-6 : f32
    %12 = vector.broadcast %cst_4 : f32 to vector<8x1xf32>
    %13 = arith.addf %11, %12 : vector<8x1xf32>
    %14 = math.rsqrt %13 : vector<8x1xf32>
    %c0_5 = arith.constant 0 : index
    %c0_6 = arith.constant 0 : index
    %15 = vector.load %arg2[%c0_5, %c0_6] : memref<8x128xf32, #tpu.memory_space<vmem>>, vector<1x128xf32>
    %c0_7 = arith.constant 0 : index
    %c0_8 = arith.constant 0 : index
    %16 = vector.load %arg3[%c0_7, %c0_8] : memref<8x128xf32, #tpu.memory_space<vmem>>, vector<1x128xf32>
    %17 = vector.broadcast %14 : vector<8x1xf32> to vector<8x128xf32>
    %18 = arith.mulf %6, %17 : vector<8x128xf32>
    %19 = vector.broadcast %15 : vector<1x128xf32> to vector<8x128xf32>
    %20 = arith.mulf %18, %19 : vector<8x128xf32>
    %21 = vector.broadcast %16 : vector<1x128xf32> to vector<8x128xf32>
    %22 = arith.addf %20, %21 : vector<8x128xf32>
    %c0_9 = arith.constant 0 : index
    %c0_10 = arith.constant 0 : index
    %23 = vector.load %arg4[%c0_9, %c0_10] : memref<8x128xf32, #tpu.memory_space<vmem>>, vector<8x128xf32>
    tpu.vector_store %arg4[%c0_9, %c0_10], %22 {strides = array<i32>} : memref<8x128xf32, #tpu.memory_space<vmem>>, vector<8x128xf32>,
    return
  }
  func.func @transform_0(%arg0: i32) -> (i32, i32) {
    %c0_i32 = arith.constant 0 : i32
    %c0_i32_0 = arith.constant 0 : i32
    return %arg0, %c0_i32 : i32, i32
  }
  func.func @transform_1(%arg0: i32) -> (i32, i32) {
    %c0_i32 = arith.constant 0 : i32
    %c0_i32_0 = arith.constant 0 : i32
    %c0_i32_1 = arith.constant 0 : i32
    return %c0_i32, %c0_i32_0 : i32, i32
  }
  func.func @transform_2(%arg0: i32) -> (i32, i32) {
    %c0_i32 = arith.constant 0 : i32
    %c0_i32_0 = arith.constant 0 : i32
    %c0_i32_1 = arith.constant 0 : i32
    return %c0_i32, %c0_i32_0 : i32, i32
  }
  func.func @transform_3(%arg0: i32) -> (i32, i32) {
    %c0_i32 = arith.constant 0 : i32
    %c0_i32_0 = arith.constant 0 : i32
    return %arg0, %c0_i32 : i32, i32
  }
}

</mosaic_0001>

<bundles_post_ra>
// kernel: tpu_custom_call.1
= control target key start
LH: loop header
LB: loop body
LE: loop exit
PB: predicated region body
PF: predicated region fallthrough
CT: control target
= control target key end

     0   :  { %8 = vsyncpa [#allocation3], 0  ;;  %s834_s0 = inlined_call_operand.hbm [shape: f32[16,128], index: 0, kind: input, shape index: {}]   ;;  %s835_s1 = inlined_call_operand.hbm [shape: f32[8,128], index: 1, kind: input, shape index: {}]   ;;  %s836_s2 = inlined_call_operand.hbm [shape: f32[8,128], index: 2, kind: input, shape index: {}]   ;;  %s837_s3 = inlined_call_operand.hbm [shape: f32[16,128], index: 3, kind: output, shape index: {}]  }
   0x1   :  { %10 = vsyncpa [#allocation3 + $0x1], 0 }
   0x2   :  { %11 = vsyncpa [#allocation6], 0 }
   0x3   :  { %12 = vsyncpa [#allocation4], 0 }
   0x4   :  { %14 = vsyncpa [#allocation4 + $0x1], 0  ;;  %s609_s12 = smov 0   ;;  %s611_s13 = smov 0  }
   0x5   :  { %s613_s14 = smov 0   ;;  %s615_s15 = smov 0  }
   0x6 LB: > { %s630_s16 = sadd.s32 4294967295, %s583_s15   ;;  %s340_s17 = sadd.s32 4294967294, %s583_s15   ;;  %s583_s15 = sphi %s615_s15, %s857_s15   ;;  %s579_s14 = sphi %s613_s14, %s856_s14   ;;  %s575_s13 = sphi %s611_s13, %s855_s13   ;;  %s571_s12 = sphi %s609_s12, %s854_s12  }
   0x7   : > { %p40_p0 = scmp.ne.s32.totalorder %s575_s13, %s571_s12  ;;  %p838_p1 = scmp.eq.s32.totalorder %s630_s16, 0 }
   0x8   : > { %p112_p3 = scmp.eq.s32.totalorder %s340_s17, 1  ;;  %p341_p5 = scmp.ge.s32.totalorder %s583_s15, 1 }
   0x9   : > { %p639_p4 = por %p838_p1, %p40_p0  ;;  %p119_p7 = scmp.lt.s32.totalorder %s583_s15, 3 }
   0xa   : > { %p644_p6 = por %p112_p3, %p40_p0  ;;  %s585_s21 = smov [#allocation5]  }
   0xb   : > { %s841_s18 = scalar_select %p639_p4, 1, 0 }
   0xc   : > { %s842_s19 = scalar_select %p644_p6, 1, 0 }
   0xd   : > { %p649_p8 = pnand %p341_p5, %p119_p7  ;;  %s132_s22 = sshll.u32 %s585_s21, 4  ;;  %s133_s22 = int_to_ptr.vmem [resolvable:$true] %s132_s22 }
   0xe   : > { %s586_s23 = smov [#allocation7]   ;;  %s665_s26 = sadd.s32 1, %s583_s15  }
   0xf   : > { %s843_s20 = scalar_select %p649_p8, 1, 0 }
  0x10   : > { %p370_p10 = pneg %p649_p8  ;;  %s143_s24 = sshll.u32 %s586_s23, 4  ;;  %s662_s24 = int_to_ptr.vmem [resolvable:$true] %s143_s24 }
  0x11   : > { %s24_s27 = ssub.s32 %s583_s15, %s665_s26  ;;  %s427_s30 = scalar_lea.hbm %s835_s1, 128 }
  0x12   : > { %p658_p11 = pnand %p370_p10, %p838_p1  ;;  %p428_p12 = scmp.ne.s32.totalorder %s835_s1, %s427_s30 }
  0x13   : > { %p434_p5 = scmp.lt.u32.totalorder %s427_s30, %s835_s1 }
  0x14   : > { %p429_p13 = pneg %p658_p11 }
  0x16   : > { %p430_p0 = pnand %p429_p13, %p428_p12 }
  0x18   : > { %p431_p3 = pneg %p430_p0 }
  0x1a   : > { %p436_p7 = pnand %p434_p5, %p431_p3 }
  0x1c   : > { %439 = shalt.err (!%p436_p7)
}
  0x1d   : > { %s440_s8 = scalar_lea.vmem %s133_s22, 128  ;;  %p448_p2 = scmp.lt.s32.totalorder %s133_s22, %s133_s22 }
  0x1e   : > { %p441_p10 = scmp.ne.s32.totalorder %s133_s22, %s440_s8  ;;  %p449_p6 = scmp.lt.s32.totalorder %s440_s8, %s440_s8 }
  0x20   : > { %p443_p9 = pnand %p441_p10, %p429_p13  ;;  %p450_p4 = por %p449_p6, %p448_p2 }
  0x22   : > { %p444_p1 = pneg %p443_p9 }
  0x24   : > { %p451_p8 = pnand %p450_p4, %p444_p1 }
  0x26   : > { %454 = shalt.err (!%p451_p8)
}
  0x27   : > { %373 = dma.hbm_to_vmem [thread:$0]  (!%p658_p11), %s835_s1, 128, %s133_s22, [#allocation6]  }
  0x28   : > { %s455_s21 = scalar_lea.hbm %s836_s2, 128 }
  0x29   : > { %p456_p9 = scmp.ne.s32.totalorder %s836_s2, %s455_s21  ;;  %p462_p4 = scmp.lt.u32.totalorder %s455_s21, %s836_s2 }
  0x2b   : > { %p458_p2 = pnand %p456_p9, %p429_p13 }
  0x2d   : > { %p459_p1 = pneg %p458_p2 }
  0x2f   : > { %p464_p6 = pnand %p462_p4, %p459_p1 }
  0x31   : > { %467 = shalt.err (!%p464_p6)
}
  0x32   : > { %s468_s22 = scalar_lea.vmem %s662_s24, 128  ;;  %p476_p3 = scmp.lt.s32.totalorder %s662_s24, %s662_s24 }
  0x33   : > { %p469_p8 = scmp.ne.s32.totalorder %s662_s24, %s468_s22  ;;  %p477_p5 = scmp.lt.s32.totalorder %s468_s22, %s468_s22 }
  0x35   : > { %p471_p12 = pnand %p469_p8, %p429_p13  ;;  %p478_p7 = por %p477_p5, %p476_p3 }
  0x37   : > { %p472_p0 = pneg %p471_p12 }
  0x39   : > { %p479_p10 = pnand %p478_p7, %p472_p0 }
  0x3b   : > { %482 = shalt.err (!%p479_p10)
}
  0x3c   : > { %376 = dma.hbm_to_vmem [thread:$0]  (!%p658_p11), %s836_s2, 128, %s662_s24, [#allocation6]  }
  0x3d   : > { %p25_p13 = scmp.eq.s32.totalorder %s24_s27, 0  ;;  %s27_s6 = sadd.s32 1, %s579_s14 }
  0x3e   : > { %p34_p9 = scmp.ne.s32.totalorder %s579_s14, %s575_s13  ;;  %p35_p2 = scmp.eq.s32.totalorder %s583_s15, 0 }
  0x3f   : > { %s724_s25 = scalar_select %p25_p13, %s579_s14, %s27_s6  }
  0x40   : > { %p36_p1 = por %p35_p2, %p34_p9  ;;  %p845_p4 = scmp.eq.s32.totalorder %s630_s16, 1 }
  0x41   : > { %p387_p8 = scmp.lt.s32.totalorder %s583_s15, 2  ;;  %s154_s8 = sand.u32 1, %s579_s14  }
  0x42   : > { %p728_p6 = por %p845_p4, %p34_p9  ;;  %s345_s9 = sshll.u32 %s154_s8, 3 }
  0x43   : > { %s346_s10 = sshll.u32 %s583_s15, 7  ;;  %s158_s27 = scalar_lea.vmem [#allocation2], %s345_s9 }
  0x44   : > { %s738_s24 = scalar_lea.hbm %s834_s0, %s346_s10  ;;  %s165_s21 = sshll.u32 %s158_s27, 4  ;;  %s740_s21 = int_to_ptr.vmem [resolvable:$true] %s165_s21 }
  0x45   : > { %p742_p11 = pnand %p387_p8, %p36_p1  ;;  %s155_s28 = scalar_lea.sflag [#allocation3], %s154_s8 }
  0x46   : > { %s483_s29 = scalar_lea.hbm %s738_s24, 128  ;;  %s488_s4 = scalar_lea.hbm %s834_s0, 256 }
  0x47   : > { %p484_p12 = scmp.ne.s32.totalorder %s738_s24, %s483_s29  ;;  %p485_p0 = pneg %p742_p11 }
  0x48   : > { %p489_p7 = scmp.lt.u32.totalorder %s738_s24, %s834_s0  ;;  %p490_p10 = scmp.lt.u32.totalorder %s488_s4, %s483_s29 }
  0x49   : > { %p486_p3 = pnand %p485_p0, %p484_p12  ;;  %p492_p9 = scmp.lt.u32.totalorder %s483_s29, %s738_s24 }
  0x4a   : > { %p491_p13 = por %p490_p10, %p489_p7 }
  0x4b   : > { %p487_p5 = pneg %p486_p3 }
  0x4c   : > { %p493_p2 = por %p492_p9, %p491_p13 }
  0x4e   : > { %p494_p1 = pnand %p493_p2, %p487_p5 }
  0x50   : > { %497 = shalt.err (!%p494_p1)
}
  0x51   : > { %s498_s8 = scalar_lea.vmem %s740_s21, 128  ;;  %s587_s9 = smov [#allocation2]  }
  0x52   : > { %p499_p4 = scmp.ne.s32.totalorder %s740_s21, %s498_s8  ;;  %s503_s10 = sshll.u32 %s587_s9, 4  ;;  %s504_s10 = int_to_ptr.vmem [resolvable:$false] %s503_s10 }
  0x53   : > { %s505_s11 = scalar_lea.vmem %s504_s10, 256  ;;  %p506_p3 = scmp.lt.s32.totalorder %s740_s21, %s504_s10 }
  0x54   : > { %p501_p8 = pnand %p499_p4, %p485_p0  ;;  %p507_p7 = scmp.lt.s32.totalorder %s505_s11, %s498_s8 }
  0x56   : > { %p502_p12 = pneg %p501_p8  ;;  %p508_p10 = por %p507_p7, %p506_p3 }
  0x58   : > { %p509_p13 = pnand %p508_p10, %p502_p12 }
  0x5a   : > { %512 = shalt.err (!%p509_p13)
}
  0x5b   : > { %380 = dma.hbm_to_vmem [thread:$0]  (!%p742_p11), %s738_s24, 128, %s740_s21, %s155_s28  }
  0x5c   : > { %p848_p5 = scmp.ne.s32.totalorder %s843_s20, 0 }
  0x5d   : > { %s774_s17 = sand.u32 (!%p848_p5), 1, %s575_s13   ;;  %p849_p0 = scmp.ne.s32.totalorder (!%p848_p5), %s841_s18, 0 }
  0x5e   : > { %174 = sbr.rel (%p848_p5) target bundleno = 431 (0x1af), region = 32  ;;  %s348_s27 = sshll.u32 (!%p848_p5), %s774_s17, 3 }
  0x5f   : > { %s177_s29 = scalar_lea.sflag (!%p848_p5), [#allocation3], %s774_s17  ;;  %s180_s30 = scalar_lea.vmem (!%p848_p5), [#allocation2], %s348_s27 }
  0x65   : > { %558 = dma.done.wait (%p849_p0), %s177_s29, 128  }
  0x66   : > { %560 = vsyncadd (%p849_p0), %s177_s29, 4294967168  ;;  %p850_p9 = scmp.eq.s32.totalorder %s630_s16, 0 }
  0x68   : > { %562 = dma.done.wait (%p850_p9), [#allocation6], 256   ;;  %p851_p11 = pmov %p850_p9 }
  0x69   : > { %v211_v0 = vld [vmem:[%s180_s30] sm:$0xff]  ;;  %v352_v9 = vld [vmem:[#allocation5] ss:$0 sm:$0xff]  ;;  %v353_v11 = vld [vmem:[#allocation7] ss:$0 sm:$0xff]  ;;  %s355_s18 = sshll.u32 %s630_s16, 7 }
  0x6a   : > { %564 = vsyncadd (%p851_p11), [#allocation6], 4294967040  ;;  %212 = vadd.xlane.f32.xlu0 %v211_v0  ;;  %s210_s20 = scalar_lea.vmem [#allocation8], %s348_s27  ;;  %s790_s28 = scalar_lea.hbm %s837_s3, %s355_s18 }
  0x6b   : > { %s251_s24 = sshll.u32 %s210_s20, 4  ;;  %s238_s22 = scalar_lea.sflag [#allocation4], %s774_s17  ;;  %s792_s24 = int_to_ptr.vmem [resolvable:$true] %s251_s24 }
  0x6c   : > { %s513_s4 = scalar_lea.vmem %s792_s24, 128  ;;  %s588_s16 = smov [#allocation8]  }
  0x6d   : > { %p514_p2 = scmp.ne.s32.totalorder %s792_s24, %s513_s4  ;;  %s517_s5 = sshll.u32 %s588_s16, 4  ;;  %s518_s5 = int_to_ptr.vmem [resolvable:$false] %s517_s5 }
  0x6e   : > { %s519_s6 = scalar_lea.vmem %s518_s5, 256  ;;  %p520_p8 = scmp.lt.s32.totalorder %s792_s24, %s518_s5 }
  0x6f   : > { %p515_p1 = pnand %p514_p2, %p728_p6  ;;  %p521_p12 = scmp.lt.s32.totalorder %s519_s6, %s513_s4 }
  0x71   : > { %p516_p4 = pneg %p515_p1  ;;  %p522_p3 = por %p521_p12, %p520_p8 }
  0x73   : > { %p523_p7 = pnand %p522_p3, %p516_p4 }
  0xf7   : > { %v213_v1 = vpop.xlane.xlu0 %212 }
  0xf8   : > { %v215_v2 = vmul.f32 0.0078125, %v213_v1 }
  0xfa   : > { %v216_v3 = vsub.f32 %v211_v0, %v215_v2 }
  0xfc   : > { %v217_v4 = vmul.f32 %v216_v3, %v216_v3 }
  0xfe   : > { %218 = vadd.xlane.f32.xlu0 %v217_v4 }
 0x18b   : > { %v219_v5 = vpop.xlane.xlu0 %218 }
 0x18c   : > { %v220_v6 = vmul.f32 0.0078125, %v219_v5 }
 0x18e   : > { %v221_v7 = vadd.f32 1e-05, %v220_v6 }
 0x190   : > { %425 = vrsqrt.f32 %v221_v7 }
 0x19a   : > { %v426_v8 = vpop.eup %425 }
 0x19b   : > { %v225_v10 = vmul.f32 %v426_v8, %v216_v3 }
 0x19d   : > { %v230_v12 = vmul.f32 %v352_v9, %v225_v10 }
 0x19f   : > { %v235_v13 = vadd.f32 %v353_v11, %v230_v12 }
 0x1a1   : > { %236 = vst [vmem:[%s210_s20] sm:$0xff] %v235_v13 }
 0x1a2   : > { %526 = shalt.err (!%p523_p7)
}
 0x1a3   : > { %s527_s8 = scalar_lea.hbm %s790_s28, 128  ;;  %s531_s11 = scalar_lea.hbm %s837_s3, 256 }
 0x1a4   : > { %p528_p10 = scmp.ne.s32.totalorder %s790_s28, %s527_s8  ;;  %p532_p0 = scmp.lt.u32.totalorder %s790_s28, %s837_s3 }
 0x1a5   : > { %p533_p9 = scmp.lt.u32.totalorder %s531_s11, %s527_s8  ;;  %p535_p2 = scmp.lt.u32.totalorder %s527_s8, %s790_s28 }
 0x1a6   : > { %p529_p13 = pnand %p528_p10, %p728_p6 }
 0x1a7   : > { %p534_p11 = por %p533_p9, %p532_p0 }
 0x1a8   : > { %p530_p5 = pneg %p529_p13 }
 0x1a9   : > { %p536_p1 = por %p535_p2, %p534_p11 }
 0x1ab   : > { %p537_p4 = pnand %p536_p1, %p530_p5 }
 0x1ad   : > { %540 = shalt.err (!%p537_p4)
}
 0x1ae   : > { %368 = dma.vmem_to_hbm [thread:$0]  (%p728_p6), %s792_s24, 128, %s790_s28, %s238_s22  }
 0x1af PF: > { %s263_s29 = sand.u32 1, %s571_s12   ;;  %p852_p8 = scmp.ne.s32.totalorder %s842_s19, 0 }
 0x1b0   : > { %p853_p12 = scmp.ge.s32.totalorder %s583_s15, 2  ;;  %s264_s30 = scalar_lea.sflag [#allocation4], %s263_s29 }
 0x1b2   : > { %p382_p3 = pnand %p853_p12, %p852_p8 }
 0x1b4   : > { %566 = dma.done.wait (!%p382_p3), %s264_s30, 128  }
 0x1b5   : > { %568 = vsyncadd (!%p382_p3), %s264_s30, 4294967168  ;;  %p17_p7 = scmp.ge.s32.totalorder %s665_s26, 4   ;;  %s854_s12 = smov %s575_s13 }
 0x1b6   : > { %s855_s13 = smov %s579_s14  ;;  %s856_s14 = smov %s724_s25 }
 0x1b7   : > { %s857_s15 = smov %s665_s26  ;;  %19 = sbr.rel (!%p17_p7) target bundleno = 6 (0x6), region = 85 }
 0x1be   :  { %269 = vsyncpa [#allocation3], 1 }
 0x1bf   :  { %271 = vsyncpa [#allocation3 + $0x1], 1 }
 0x1c0   :  { %272 = vsyncpa [#allocation6], 1 }
 0x1c1   :  { %273 = vsyncpa [#allocation4], 1 }
 0x1c2   :  { %275 = vsyncpa [#allocation4 + $0x1], 1 }

</bundles_post_ra>
